<compile_context>
chip_gen: v6e
topology: v6e:2x2x1
jax: 0.10.0
libtpu: 0.0.40
codegen_flags: <defaults>
</compile_context>

<pallas_src>
import functools
import numpy as np

import jax
import jax.numpy as jnp
from jax import lax, random
from jax.experimental import pallas as pl
from jax.experimental.pallas import tpu as pltpu

EPS_BN = 1e-5


def _upconv_init_kernel(x_ref, b1_ref, s1_ref, c1_ref, b2_ref, s2_ref, c2_ref,
                        o_ref, xpad_ref, ypad_ref, *, H, WC):
    """Fused conv3x3+BN+ReLU -> conv3x3+BN+ReLU -> +x for one batch image.

    x_ref   : (1, H, WC)   f32  unpadded input rows, lane-dense (idx = x*C + c)
    b*_ref  : (3, WC, WC)  bf16 block-banded conv weights (one band per dy)
    s*/c*   : (1, WC)      f32  folded BN scale / (bias+BN) shift, tiled over x
    o_ref   : (1, H, WC)   f32  output
    xpad/ypad: (H+2, WC)   f32  VMEM scratch with a 1-row top/bottom zero halo
    """
    # Border-only zeroing: just the 2 halo rows of each scratch (the interiors
    # are fully overwritten below).  Done every step (cost: 4 single-row
    # stores) so it stays correct when the batch grid axis is megacore-split.
    zrow = jnp.zeros((1, WC), jnp.float32)
    xpad_ref[0:1, :] = zrow
    xpad_ref[H + 1:H + 2, :] = zrow
    ypad_ref[0:1, :] = zrow
    ypad_ref[H + 1:H + 2, :] = zrow

    x = x_ref[0]                                   # (H, WC) f32, aligned
    xpad_ref[1:H + 1, :] = x                       # add 1-row halo in VMEM

    def conv_bn_relu(pad_ref, band_ref, s_ref, c_ref):
        # Three dy-shifted dots; kx shifts + x-padding live inside the bands.
        # LHS is cast to bf16 once per dy (consumed directly by the MXU).
        acc = jnp.dot(pad_ref[0:H, :].astype(jnp.bfloat16), band_ref[0],
                      preferred_element_type=jnp.float32)
        acc = acc + jnp.dot(pad_ref[1:H + 1, :].astype(jnp.bfloat16), band_ref[1],
                            preferred_element_type=jnp.float32)
        acc = acc + jnp.dot(pad_ref[2:H + 2, :].astype(jnp.bfloat16), band_ref[2],
                            preferred_element_type=jnp.float32)
        # Fused (bias+BN) affine + ReLU epilogue, all in f32, lane-dense.
        return jnp.maximum(acc * s_ref[...] + c_ref[...], 0.0)

    y1 = conv_bn_relu(xpad_ref, b1_ref, s1_ref, c1_ref)      # (H, WC) f32
    ypad_ref[1:H + 1, :] = y1                                 # re-pad in VMEM
    y2 = conv_bn_relu(ypad_ref, b2_ref, s2_ref, c2_ref)

    o_ref[0] = y2 + x                       # residual add fused into the store


def up_conv_init_forward(x_nchw, params):
    """Forward pass of up_conv_init. x: (N, C, H, W) f32 -> (N, C, H, W) f32."""
    w1, b1 = params["conv1"]
    w2, b2 = params["conv2"]
    N, C, H, W = x_nchw.shape
    WC = W * C

    # NCHW -> (N, H, W*C): one XLA transpose+reshape pass; rows are lane-dense.
    # TODO(synk): disappears entirely if the surrounding model stays NHWC.
    x2d = jnp.transpose(x_nchw, (0, 2, 3, 1)).reshape(N, H, WC).astype(jnp.float32)

    def fold(w, b, bn):
        """Fold conv bias + eval-mode BN into an affine, and build the banded
        per-dy weight matrices B_dy[x_in*C+ci, x_out*C+co]."""
        gamma, beta, mean, var = bn
        scale = gamma / jnp.sqrt(var + EPS_BN)
        shift = (b - mean) * scale + beta
        taps = jnp.transpose(w, (2, 3, 1, 0))           # (ky, kx, Cin, Cout)
        xs = jnp.arange(W)
        bands = []
        for dy in range(3):
            blk = jnp.zeros((W, C, W, C), jnp.float32)
            for dx in range(3):
                # x_in = x_out + dx - 1 ; out-of-range taps (the x zero-padding)
                # are simply absent from the band.
                ind = (xs[:, None] == xs[None, :] + (dx - 1)).astype(jnp.float32)
                blk = blk + ind[:, None, :, None] * taps[dy, dx][None, :, None, :]
            bands.append(blk.reshape(WC, WC))
        band = jnp.stack(bands, axis=0).astype(jnp.bfloat16)       # (3, WC, WC)
        s_vec = jnp.tile(scale.astype(jnp.float32), W).reshape(1, WC)
        c_vec = jnp.tile(shift.astype(jnp.float32), W).reshape(1, WC)
        return band, s_vec, c_vec

    band1, s1, c1 = fold(w1, b1, params["bn1"])
    band2, s2, c2 = fold(w2, b2, params["bn2"])

    # Scoped-VMEM budget: double-buffered in/out blocks + 2 banded weights +
    # the two padded scratches + headroom for in-kernel temporaries.
    est = (2 * (H * WC * 4) * 2
           + 2 * (3 * WC * WC * 2) * 2
           + 2 * ((H + 2) * WC * 4)
           + 8 * (H * WC * 4))
    vmem_limit = int(min(64 * 2 ** 20, max(32 * 2 ** 20, 2 * est)))

    kernel = functools.partial(_upconv_init_kernel, H=H, WC=WC)
    out2d = pl.pallas_call(
        kernel,
        out_shape=jax.ShapeDtypeStruct((N, H, WC), jnp.float32),
        grid_spec=pltpu.PrefetchScalarGridSpec(
            num_scalar_prefetch=0,
            grid=(N,),
            in_specs=[
                pl.BlockSpec((1, H, WC), lambda n: (n, 0, 0)),
                pl.BlockSpec((3, WC, WC), lambda n: (0, 0, 0)),   # DMA'd once
                pl.BlockSpec((1, WC), lambda n: (0, 0)),
                pl.BlockSpec((1, WC), lambda n: (0, 0)),
                pl.BlockSpec((3, WC, WC), lambda n: (0, 0, 0)),   # DMA'd once
                pl.BlockSpec((1, WC), lambda n: (0, 0)),
                pl.BlockSpec((1, WC), lambda n: (0, 0)),
            ],
            out_specs=pl.BlockSpec((1, H, WC), lambda n: (n, 0, 0)),
            scratch_shapes=[pltpu.VMEM((H + 2, WC), jnp.float32),
                            pltpu.VMEM((H + 2, WC), jnp.float32)],
        ),
        compiler_params=pltpu.CompilerParams(
            dimension_semantics=("parallel",),
            vmem_limit_bytes=vmem_limit),
    )(x2d, band1, s1, c1, band2, s2, c2)

    out = out2d.reshape(N, H, W, C)
    return jnp.transpose(out, (0, 3, 1, 2))                      # back to NCHW


# ---------------------------------------------------------------------------
# Pure-JAX reference (mirrors the PyTorch module, eval-mode BN)
# ---------------------------------------------------------------------------

def up_conv_init_reference(x_nchw, params):
    def conv(x, w, b):
        y = lax.conv_general_dilated(
            x, w, window_strides=(1, 1), padding=((1, 1), (1, 1)),
            dimension_numbers=("NCHW", "OIHW", "NCHW"))
        return y + b.reshape(1, -1, 1, 1)

    def bn(x, p):
        gamma, beta, mean, var = p
        scale = gamma / jnp.sqrt(var + EPS_BN)
        shift = beta - mean * scale
        return x * scale.reshape(1, -1, 1, 1) + shift.reshape(1, -1, 1, 1)

    w1, b1 = params["conv1"]
    w2, b2 = params["conv2"]
    y = jax.nn.relu(bn(conv(x_nchw, w1, b1), params["bn1"]))
    y = jax.nn.relu(bn(conv(y, w2, b2), params["bn2"]))
    return y + x_nchw


# ---------------------------------------------------------------------------

if __name__ == "__main__":
    N, C, H, W = 2, 8, 16, 16           # small demo shapes (in_channels = 8)
    key = random.PRNGKey(0)
    k_x, k_w1, k_b1, k_w2, k_b2 = random.split(key, 5)
    std = 1.0 / float(np.sqrt(C * 9))

    params = {
        "conv1": (random.normal(k_w1, (C, C, 3, 3), jnp.float32) * std,
                  random.normal(k_b1, (C,), jnp.float32) * std),
        "conv2": (random.normal(k_w2, (C, C, 3, 3), jnp.float32) * std,
                  random.normal(k_b2, (C,), jnp.float32) * std),
        # BatchNorm2d eval-mode default parameters (gamma, beta, mean, var)
        "bn1": (jnp.ones((C,), jnp.float32), jnp.zeros((C,), jnp.float32),
                jnp.zeros((C,), jnp.float32), jnp.ones((C,), jnp.float32)),
        "bn2": (jnp.ones((C,), jnp.float32), jnp.zeros((C,), jnp.float32),
                jnp.zeros((C,), jnp.float32), jnp.ones((C,), jnp.float32)),
    }
    x = random.normal(k_x, (N, C, H, W), jnp.float32)

    fwd = jax.jit(lambda inp: up_conv_init_forward(inp, params))
    out = fwd(x)
    jax.block_until_ready(out)

    ref = up_conv_init_reference(x, params)
    assert out.shape == (N, C, H, W), out.shape
    assert bool(jnp.isfinite(out).all())
    err = float(jnp.max(jnp.abs(out - ref)))
    assert err < 5e-2, f"max abs err vs reference: {err}"
    print("KERNEL_OK")
</pallas_src>

<mosaic_0001>
module attributes {stable_mosaic.version = 11 : i64} {
  func.func @_upconv_init_kernel(%arg0: i32, %arg1: memref<1x16x128xf32, #tpu.memory_space<vmem>>, %arg2: memref<3x128x128xbf16, #tpu.memory_space<vmem>>, %arg3: memref<1x128xf32, #tpu.memory_space<vmem>>, %arg4: memref<1x128xf32, #tpu.memory_space<vmem>>, %arg5: memref<3x128x128xbf16, #tpu.memory_space<vmem>>, %arg6: memref<1x128xf32, #tpu.memory_space<vmem>>, %arg7: memref<1x128xf32, #tpu.memory_space<vmem>>, %arg8: memref<1x16x128xf32, #tpu.memory_space<vmem>>, %arg9: memref<18x128xf32, #tpu.memory_space<vmem>>, %arg10: memref<18x128xf32, #tpu.memory_space<vmem>>) attributes {dimension_semantics = [#tpu.dimension_semantics<parallel>], iteration_bounds = array<i64: 2>, scalar_prefetch = 0 : i64, scratch_operands = 2 : i64, tpu.core_type = #tpu.core_type<tc>, window_params = [{transform_indices = @transform_0, window_bounds = array<i64: 1, 16, 128>}, {pipeline_mode = #tpu.pipeline_mode<synchronous>, transform_indices = @transform_1, window_bounds = array<i64: 3, 128, 128>}, {pipeline_mode = #tpu.pipeline_mode<synchronous>, transform_indices = @transform_2, window_bounds = array<i64: 1, 128>}, {pipeline_mode = #tpu.pipeline_mode<synchronous>, transform_indices = @transform_3, window_bounds = array<i64: 1, 128>}, {pipeline_mode = #tpu.pipeline_mode<synchronous>, transform_indices = @transform_4, window_bounds = array<i64: 3, 128, 128>}, {pipeline_mode = #tpu.pipeline_mode<synchronous>, transform_indices = @transform_5, window_bounds = array<i64: 1, 128>}, {pipeline_mode = #tpu.pipeline_mode<synchronous>, transform_indices = @transform_6, window_bounds = array<i64: 1, 128>}, {transform_indices = @transform_7, window_bounds = array<i64: 1, 16, 128>}]} {
    %cst = arith.constant 0.000000e+00 : f32
    %0 = vector.broadcast %cst : f32 to vector<1x128xf32>
    %c0 = arith.constant 0 : index
    %c0_0 = arith.constant 0 : index
    %1 = vector.load %arg9[%c0, %c0_0] : memref<18x128xf32, #tpu.memory_space<vmem>>, vector<1x128xf32>
    tpu.vector_store %arg9[%c0, %c0_0], %0 {strides = array<i32>} : memref<18x128xf32, #tpu.memory_space<vmem>>, vector<1x128xf32>,
    %c17 = arith.constant 17 : index
    %c0_1 = arith.constant 0 : index
    %2 = vector.load %arg9[%c17, %c0_1] : memref<18x128xf32, #tpu.memory_space<vmem>>, vector<1x128xf32>
    tpu.vector_store %arg9[%c17, %c0_1], %0 {strides = array<i32>} : memref<18x128xf32, #tpu.memory_space<vmem>>, vector<1x128xf32>,
    %c0_2 = arith.constant 0 : index
    %c0_3 = arith.constant 0 : index
    %3 = vector.load %arg10[%c0_2, %c0_3] : memref<18x128xf32, #tpu.memory_space<vmem>>, vector<1x128xf32>
    tpu.vector_store %arg10[%c0_2, %c0_3], %0 {strides = array<i32>} : memref<18x128xf32, #tpu.memory_space<vmem>>, vector<1x128xf32>,
    %c17_4 = arith.constant 17 : index
    %c0_5 = arith.constant 0 : index
    %4 = vector.load %arg10[%c17_4, %c0_5] : memref<18x128xf32, #tpu.memory_space<vmem>>, vector<1x128xf32>
    tpu.vector_store %arg10[%c17_4, %c0_5], %0 {strides = array<i32>} : memref<18x128xf32, #tpu.memory_space<vmem>>, vector<1x128xf32>,
    %c0_6 = arith.constant 0 : index
    %c0_7 = arith.constant 0 : index
    %c0_8 = arith.constant 0 : index
    %5 = vector.load %arg1[%c0_6, %c0_7, %c0_8] : memref<1x16x128xf32, #tpu.memory_space<vmem>>, vector<1x16x128xf32>
    %6 = vector.shape_cast %5 : vector<1x16x128xf32> to vector<16x128xf32>
    %c1 = arith.constant 1 : index
    %c0_9 = arith.constant 0 : index
    %7 = vector.load %arg9[%c1, %c0_9] : memref<18x128xf32, #tpu.memory_space<vmem>>, vector<16x128xf32>
    tpu.vector_store %arg9[%c1, %c0_9], %6 {strides = array<i32>} : memref<18x128xf32, #tpu.memory_space<vmem>>, vector<16x128xf32>,
    %c0_10 = arith.constant 0 : index
    %c0_11 = arith.constant 0 : index
    %8 = vector.load %arg9[%c0_10, %c0_11] : memref<18x128xf32, #tpu.memory_space<vmem>>, vector<16x128xf32>
    %9 = arith.truncf %8 : vector<16x128xf32> to vector<16x128xbf16>
    %c0_12 = arith.constant 0 : index
    %c0_13 = arith.constant 0 : index
    %c0_14 = arith.constant 0 : index
    %10 = vector.load %arg2[%c0_12, %c0_13, %c0_14] : memref<3x128x128xbf16, #tpu.memory_space<vmem>>, vector<1x128x128xbf16>
    %11 = vector.shape_cast %10 : vector<1x128x128xbf16> to vector<128x128xbf16>
    %cst_15 = arith.constant dense<0.000000e+00> : vector<16x128xf32>
    %12 = tpu.matmul %9, %11, %cst_15 {dimension_numbers = #tpu.dot_dimension_numbers<[1], [0], [0], [1], [0, 0, 1, 1], [], []>} : vector<16x128xbf16>, vector<128x128xbf16>, vector<16x128xf32> -> vector<16x128xf32>
    %c1_16 = arith.constant 1 : index
    %c0_17 = arith.constant 0 : index
    %13 = vector.load %arg9[%c1_16, %c0_17] : memref<18x128xf32, #tpu.memory_space<vmem>>, vector<16x128xf32>
    %14 = arith.truncf %13 : vector<16x128xf32> to vector<16x128xbf16>
    %c1_18 = arith.constant 1 : index
    %c0_19 = arith.constant 0 : index
    %c0_20 = arith.constant 0 : index
    %15 = vector.load %arg2[%c1_18, %c0_19, %c0_20] : memref<3x128x128xbf16, #tpu.memory_space<vmem>>, vector<1x128x128xbf16>
    %16 = vector.shape_cast %15 : vector<1x128x128xbf16> to vector<128x128xbf16>
    %cst_21 = arith.constant dense<0.000000e+00> : vector<16x128xf32>
    %17 = tpu.matmul %14, %16, %cst_21 {dimension_numbers = #tpu.dot_dimension_numbers<[1], [0], [0], [1], [0, 0, 1, 1], [], []>} : vector<16x128xbf16>, vector<128x128xbf16>, vector<16x128xf32> -> vector<16x128xf32>
    %18 = arith.addf %12, %17 : vector<16x128xf32>
    %c2 = arith.constant 2 : index
    %c0_22 = arith.constant 0 : index
    %19 = vector.load %arg9[%c2, %c0_22] : memref<18x128xf32, #tpu.memory_space<vmem>>, vector<16x128xf32>
    %20 = arith.truncf %19 : vector<16x128xf32> to vector<16x128xbf16>
    %c2_23 = arith.constant 2 : index
    %c0_24 = arith.constant 0 : index
    %c0_25 = arith.constant 0 : index
    %21 = vector.load %arg2[%c2_23, %c0_24, %c0_25] : memref<3x128x128xbf16, #tpu.memory_space<vmem>>, vector<1x128x128xbf16>
    %22 = vector.shape_cast %21 : vector<1x128x128xbf16> to vector<128x128xbf16>
    %cst_26 = arith.constant dense<0.000000e+00> : vector<16x128xf32>
    %23 = tpu.matmul %20, %22, %cst_26 {dimension_numbers = #tpu.dot_dimension_numbers<[1], [0], [0], [1], [0, 0, 1, 1], [], []>} : vector<16x128xbf16>, vector<128x128xbf16>, vector<16x128xf32> -> vector<16x128xf32>
    %24 = arith.addf %18, %23 : vector<16x128xf32>
    %c0_27 = arith.constant 0 : index
    %c0_28 = arith.constant 0 : index
    %25 = vector.load %arg3[%c0_27, %c0_28] : memref<1x128xf32, #tpu.memory_space<vmem>>, vector<1x128xf32>
    %26 = vector.broadcast %25 : vector<1x128xf32> to vector<16x128xf32>
    %27 = arith.mulf %24, %26 : vector<16x128xf32>
    %c0_29 = arith.constant 0 : index
    %c0_30 = arith.constant 0 : index
    %28 = vector.load %arg4[%c0_29, %c0_30] : memref<1x128xf32, #tpu.memory_space<vmem>>, vector<1x128xf32>
    %29 = vector.broadcast %28 : vector<1x128xf32> to vector<16x128xf32>
    %30 = arith.addf %27, %29 : vector<16x128xf32>
    %cst_31 = arith.constant 0.000000e+00 : f32
    %31 = vector.broadcast %cst_31 : f32 to vector<16x128xf32>
    %32 = arith.maximumf %30, %31 : vector<16x128xf32>
    %c1_32 = arith.constant 1 : index
    %c0_33 = arith.constant 0 : index
    %33 = vector.load %arg10[%c1_32, %c0_33] : memref<18x128xf32, #tpu.memory_space<vmem>>, vector<16x128xf32>
    tpu.vector_store %arg10[%c1_32, %c0_33], %32 {strides = array<i32>} : memref<18x128xf32, #tpu.memory_space<vmem>>, vector<16x128xf32>,
    %c0_34 = arith.constant 0 : index
    %c0_35 = arith.constant 0 : index
    %34 = vector.load %arg10[%c0_34, %c0_35] : memref<18x128xf32, #tpu.memory_space<vmem>>, vector<16x128xf32>
    %35 = arith.truncf %34 : vector<16x128xf32> to vector<16x128xbf16>
    %c0_36 = arith.constant 0 : index
    %c0_37 = arith.constant 0 : index
    %c0_38 = arith.constant 0 : index
    %36 = vector.load %arg5[%c0_36, %c0_37, %c0_38] : memref<3x128x128xbf16, #tpu.memory_space<vmem>>, vector<1x128x128xbf16>
    %37 = vector.shape_cast %36 : vector<1x128x128xbf16> to vector<128x128xbf16>
    %cst_39 = arith.constant dense<0.000000e+00> : vector<16x128xf32>
    %38 = tpu.matmul %35, %37, %cst_39 {dimension_numbers = #tpu.dot_dimension_numbers<[1], [0], [0], [1], [0, 0, 1, 1], [], []>} : vector<16x128xbf16>, vector<128x128xbf16>, vector<16x128xf32> -> vector<16x128xf32>
    %c1_40 = arith.constant 1 : index
    %c0_41 = arith.constant 0 : index
    %39 = vector.load %arg10[%c1_40, %c0_41] : memref<18x128xf32, #tpu.memory_space<vmem>>, vector<16x128xf32>
    %40 = arith.truncf %39 : vector<16x128xf32> to vector<16x128xbf16>
    %c1_42 = arith.constant 1 : index
    %c0_43 = arith.constant 0 : index
    %c0_44 = arith.constant 0 : index
    %41 = vector.load %arg5[%c1_42, %c0_43, %c0_44] : memref<3x128x128xbf16, #tpu.memory_space<vmem>>, vector<1x128x128xbf16>
    %42 = vector.shape_cast %41 : vector<1x128x128xbf16> to vector<128x128xbf16>
    %cst_45 = arith.constant dense<0.000000e+00> : vector<16x128xf32>
    %43 = tpu.matmul %40, %42, %cst_45 {dimension_numbers = #tpu.dot_dimension_numbers<[1], [0], [0], [1], [0, 0, 1, 1], [], []>} : vector<16x128xbf16>, vector<128x128xbf16>, vector<16x128xf32> -> vector<16x128xf32>
    %44 = arith.addf %38, %43 : vector<16x128xf32>
    %c2_46 = arith.constant 2 : index
    %c0_47 = arith.constant 0 : index
    %45 = vector.load %arg10[%c2_46, %c0_47] : memref<18x128xf32, #tpu.memory_space<vmem>>, vector<16x128xf32>
    %46 = arith.truncf %45 : vector<16x128xf32> to vector<16x128xbf16>
    %c2_48 = arith.constant 2 : index
    %c0_49 = arith.constant 0 : index
    %c0_50 = arith.constant 0 : index
    %47 = vector.load %arg5[%c2_48, %c0_49, %c0_50] : memref<3x128x128xbf16, #tpu.memory_space<vmem>>, vector<1x128x128xbf16>
    %48 = vector.shape_cast %47 : vector<1x128x128xbf16> to vector<128x128xbf16>
    %cst_51 = arith.constant dense<0.000000e+00> : vector<16x128xf32>
    %49 = tpu.matmul %46, %48, %cst_51 {dimension_numbers = #tpu.dot_dimension_numbers<[1], [0], [0], [1], [0, 0, 1, 1], [], []>} : vector<16x128xbf16>, vector<128x128xbf16>, vector<16x128xf32> -> vector<16x128xf32>
    %50 = arith.addf %44, %49 : vector<16x128xf32>
    %c0_52 = arith.constant 0 : index
    %c0_53 = arith.constant 0 : index
    %51 = vector.load %arg6[%c0_52, %c0_53] : memref<1x128xf32, #tpu.memory_space<vmem>>, vector<1x128xf32>
    %52 = vector.broadcast %51 : vector<1x128xf32> to vector<16x128xf32>
    %53 = arith.mulf %50, %52 : vector<16x128xf32>
    %c0_54 = arith.constant 0 : index
    %c0_55 = arith.constant 0 : index
    %54 = vector.load %arg7[%c0_54, %c0_55] : memref<1x128xf32, #tpu.memory_space<vmem>>, vector<1x128xf32>
    %55 = vector.broadcast %54 : vector<1x128xf32> to vector<16x128xf32>
    %56 = arith.addf %53, %55 : vector<16x128xf32>
    %cst_56 = arith.constant 0.000000e+00 : f32
    %57 = vector.broadcast %cst_56 : f32 to vector<16x128xf32>
    %58 = arith.maximumf %56, %57 : vector<16x128xf32>
    %59 = arith.addf %58, %6 : vector<16x128xf32>
    %c0_57 = arith.constant 0 : index
    %c0_58 = arith.constant 0 : index
    %c0_59 = arith.constant 0 : index
    %60 = vector.load %arg8[%c0_57, %c0_58, %c0_59] : memref<1x16x128xf32, #tpu.memory_space<vmem>>, vector<1x16x128xf32>
    %61 = vector.shape_cast %60 : vector<1x16x128xf32> to vector<16x128xf32>
    %62 = vector.shape_cast %59 : vector<16x128xf32> to vector<1x16x128xf32>
    tpu.vector_store %arg8[%c0_57, %c0_58, %c0_59], %62 {strides = array<i32>} : memref<1x16x128xf32, #tpu.memory_space<vmem>>, vector<1x16x128xf32>,
    return
  }
  func.func @transform_0(%arg0: i32) -> (i32, i32, i32) {
    %c0_i32 = arith.constant 0 : i32
    %c0_i32_0 = arith.constant 0 : i32
    %c0_i32_1 = arith.constant 0 : i32
    return %arg0, %c0_i32, %c0_i32_0 : i32, i32, i32
  }
  func.func @transform_1(%arg0: i32) -> (i32, i32, i32) {
    %c0_i32 = arith.constant 0 : i32
    %c0_i32_0 = arith.constant 0 : i32
    %c0_i32_1 = arith.constant 0 : i32
    %c0_i32_2 = arith.constant 0 : i32
    return %c0_i32, %c0_i32_0, %c0_i32_1 : i32, i32, i32
  }
  func.func @transform_2(%arg0: i32) -> (i32, i32) {
    %c0_i32 = arith.constant 0 : i32
    %c0_i32_0 = arith.constant 0 : i32
    %c0_i32_1 = arith.constant 0 : i32
    return %c0_i32, %c0_i32_0 : i32, i32
  }
  func.func @transform_3(%arg0: i32) -> (i32, i32) {
    %c0_i32 = arith.constant 0 : i32
    %c0_i32_0 = arith.constant 0 : i32
    %c0_i32_1 = arith.constant 0 : i32
    return %c0_i32, %c0_i32_0 : i32, i32
  }
  func.func @transform_4(%arg0: i32) -> (i32, i32, i32) {
    %c0_i32 = arith.constant 0 : i32
    %c0_i32_0 = arith.constant 0 : i32
    %c0_i32_1 = arith.constant 0 : i32
    %c0_i32_2 = arith.constant 0 : i32
    return %c0_i32, %c0_i32_0, %c0_i32_1 : i32, i32, i32
  }
  func.func @transform_5(%arg0: i32) -> (i32, i32) {
    %c0_i32 = arith.constant 0 : i32
    %c0_i32_0 = arith.constant 0 : i32
    %c0_i32_1 = arith.constant 0 : i32
    return %c0_i32, %c0_i32_0 : i32, i32
  }
  func.func @transform_6(%arg0: i32) -> (i32, i32) {
    %c0_i32 = arith.constant 0 : i32
    %c0_i32_0 = arith.constant 0 : i32
    %c0_i32_1 = arith.constant 0 : i32
    return %c0_i32, %c0_i32_0 : i32, i32
  }
  func.func @transform_7(%arg0: i32) -> (i32, i32, i32) {
    %c0_i32 = arith.constant 0 : i32
    %c0_i32_0 = arith.constant 0 : i32
    %c0_i32_1 = arith.constant 0 : i32
    return %arg0, %c0_i32, %c0_i32_0 : i32, i32, i32
  }
}

</mosaic_0001>

<bundles_post_ra>
// kernel: tile.10
= control target key start
LH: loop header
LB: loop body
LE: loop exit
PB: predicated region body
PF: predicated region fallthrough
CT: control target
= control target key end

     0   :  { %s28_s0 = inlined_call_operand.vmem [shape: f32[8], index: 0, kind: input, shape index: {}]   ;;  %s29_s1 = inlined_call_operand.vmem [shape: f32[16,8], index: 1, kind: output, shape index: {}]  }
   0x1   :  { %v4_v0 = vld [vmem:[%s28_s0] ss:$0 sm:$0xff] }
   0x2   :  { %5 = vst [vmem:[%s29_s1] sm:$0xff] %v4_v0  ;;  %8 = vst [vmem:[%s29_s1 + $0x8] sm:$0xff] %v4_v0 }

// kernel: tile.11
= control target key start
LH: loop header
LB: loop body
LE: loop exit
PB: predicated region body
PF: predicated region fallthrough
CT: control target
= control target key end

     0   :  { %s133_s10 = smov 120   ;;  %s134_s11 = smov 104   ;;  %vm3_vm0 = vcmask 64512   ;;  %vm9_vm1 = vcmask 1048512   ;;  %vm15_vm2 = vcmask 982912   ;;  %vm21_vm3 = vcmask 917312   ;;  %s209_s0 = inlined_call_operand.vmem [shape: f32[16,8], index: 0, kind: input, shape index: {}]   ;;  %s210_s1 = inlined_call_operand.vmem [shape: f32[1,128], index: 1, kind: output, shape index: {}]  }
   0x1   :  { %v103_v0 = vld [vmem:[%s209_s0 + $0xf] sm:$0x1]   ;;  %v105_v1 = vld [vmem:[%s209_s0 + $0xd] sm:$0x1]   ;;  %v104_v2 = vld [vmem:[%s209_s0 + $0xe] sm:$0x1]  }
   0x2   :  { %7 = vrot.lane.b32.xlu0 %v103_v0, %s133_s10  ;;  %19 = vrot.lane.b32.xlu1 %v105_v1, %s134_s11  ;;  %v106_v3 = vld [vmem:[%s209_s0 + $0xc] sm:$0x1]   ;;  %s135_s16 = smov 112   ;;  %s136_s17 = smov 96   ;;  %v107_v4 = vld [vmem:[%s209_s0 + $0xb] sm:$0x1]  }
   0x3   :  { %v108_v5 = vld [vmem:[%s209_s0 + $0xa] sm:$0x1]   ;;  %v2_v6 = vld [vmem:[%s209_s0] sm:$0x1]   ;;  %s137_s24 = smov 88   ;;  %s138_s25 = smov 80  }
   0x4   :  { %4 = vst.msk [vmem:[#allocation0] sm:$0x1] %vm3_vm0, %v2_v6   ;;  %v109_v7 = vld [vmem:[%s209_s0 + $0x9] sm:$0x1]   ;;  %v110_v8 = vld [vmem:[%s209_s0 + $0x8] sm:$0x1]  }
   0x5   :  { %s139_s30 = smov 72   ;;  %s140_s2 = smov 64   ;;  %v111_v9 = vld [vmem:[%s209_s0 + $0x7] sm:$0x1]   ;;  %v112_v10 = vld [vmem:[%s209_s0 + $0x6] sm:$0x1]  }
   0x6   :  { %13 = vrot.lane.b32.xlu0 %v104_v2, %s135_s16  ;;  %25 = vrot.lane.b32.xlu1 %v106_v3, %s136_s17  ;;  %s141_s7 = smov 56   ;;  %s142_s8 = smov 48   ;;  %v113_v11 = vld [vmem:[%s209_s0 + $0x5] sm:$0x1]   ;;  %v114_v12 = vld [vmem:[%s209_s0 + $0x4] sm:$0x1]  }
   0x7   :  { %s143_s13 = smov 40   ;;  %s144_s14 = smov 32   ;;  %v115_v13 = vld [vmem:[%s209_s0 + $0x3] sm:$0x1]   ;;  %v116_v14 = vld [vmem:[%s209_s0 + $0x2] sm:$0x1]  }
   0x8   :  { %s145_s19 = smov 24   ;;  %s146_s20 = smov 16   ;;  %v117_v15 = vld [vmem:[%s209_s0 + $0x1] sm:$0x1]   ;;  %vm27_vm4 = vcmask 851712   ;;  %vm33_vm5 = vcmask 786112  }
   0x9   :  { %s147_s0 = smov 8   ;;  %vm39_vm6 = vcmask 720512   ;;  %vm45_vm7 = vcmask 654912   ;;  %vm51_vm8 = vcmask 589312   ;;  %vm57_vm9 = vcmask 523712  }
   0xa   :  { %31 = vrot.lane.b32.xlu0 %v107_v4, %s137_s24  ;;  %37 = vrot.lane.b32.xlu1 %v108_v5, %s138_s25  ;;  %vm63_vm10 = vcmask 458112   ;;  %vm69_vm11 = vcmask 392512   ;;  %vm75_vm12 = vcmask 326912   ;;  %vm81_vm13 = vcmask 261312  }
   0xb   :  { %vm87_vm14 = vcmask 195712   ;;  %vm93_vm15 = vcmask 130112  }
   0xe   :  { %43 = vrot.lane.b32.xlu0 %v109_v7, %s139_s30  ;;  %49 = vrot.lane.b32.xlu1 %v110_v8, %s140_s2 }
  0x12   :  { %55 = vrot.lane.b32.xlu0 %v111_v9, %s141_s7  ;;  %61 = vrot.lane.b32.xlu1 %v112_v10, %s142_s8 }
  0x16   :  { %67 = vrot.lane.b32.xlu0 %v113_v11, %s143_s13  ;;  %73 = vrot.lane.b32.xlu1 %v114_v12, %s144_s14 }
  0x1a   :  { %79 = vrot.lane.b32.xlu0 %v115_v13, %s145_s19  ;;  %85 = vrot.lane.b32.xlu1 %v116_v14, %s146_s20 }
  0x1e   :  { %91 = vrot.lane.b32.xlu0 %v117_v15, %s147_s0 }
  0x74   :  { %v8_v16 = vpop.permute.xlu0 %7   ;;  %v20_v17 = vpop.permute.xlu1 %19  }
  0x75   :  { %10 = vst.msk [vmem:[#allocation0] sm:$0x1] %vm9_vm1, %v8_v16  }
  0x78   :  { %v14_v18 = vpop.permute.xlu0 %13   ;;  %v26_v19 = vpop.permute.xlu1 %25  }
  0x79   :  { %16 = vst.msk [vmem:[#allocation0] sm:$0x1] %vm15_vm2, %v14_v18  }
  0x7a   :  { %22 = vst.msk [vmem:[#allocation0] sm:$0x1] %vm21_vm3, %v20_v17  }
  0x7b   :  { %28 = vst.msk [vmem:[#allocation0] sm:$0x1] %vm27_vm4, %v26_v19  }
  0x7c   :  { %v32_v20 = vpop.permute.xlu0 %31   ;;  %v38_v21 = vpop.permute.xlu1 %37  }
  0x7d   :  { %34 = vst.msk [vmem:[#allocation0] sm:$0x1] %vm33_vm5, %v32_v20  }
  0x7e   :  { %40 = vst.msk [vmem:[#allocation0] sm:$0x1] %vm39_vm6, %v38_v21  }
  0x80   :  { %v44_v22 = vpop.permute.xlu0 %43   ;;  %v50_v23 = vpop.permute.xlu1 %49  }
  0x81   :  { %46 = vst.msk [vmem:[#allocation0] sm:$0x1] %vm45_vm7, %v44_v22  }
  0x82   :  { %52 = vst.msk [vmem:[#allocation0] sm:$0x1] %vm51_vm8, %v50_v23  }
  0x84   :  { %v56_v24 = vpop.permute.xlu0 %55   ;;  %v62_v25 = vpop.permute.xlu1 %61  }
  0x85   :  { %58 = vst.msk [vmem:[#allocation0] sm:$0x1] %vm57_vm9, %v56_v24  }
  0x86   :  { %64 = vst.msk [vmem:[#allocation0] sm:$0x1] %vm63_vm10, %v62_v25  }
  0x88   :  { %v68_v26 = vpop.permute.xlu0 %67   ;;  %v74_v27 = vpop.permute.xlu1 %73  }
  0x89   :  { %70 = vst.msk [vmem:[#allocation0] sm:$0x1] %vm69_vm11, %v68_v26  }
  0x8a   :  { %76 = vst.msk [vmem:[#allocation0] sm:$0x1] %vm75_vm12, %v74_v27  }
  0x8c   :  { %v80_v28 = vpop.permute.xlu0 %79   ;;  %v86_v29 = vpop.permute.xlu1 %85  }
  0x8d   :  { %82 = vst.msk [vmem:[#allocation0] sm:$0x1] %vm81_vm13, %v80_v28  }
  0x8e   :  { %88 = vst.msk [vmem:[#allocation0] sm:$0x1] %vm87_vm14, %v86_v29  }
  0x90   :  { %v92_v30 = vpop.permute.xlu0 %91  }
  0x91   :  { %94 = vst.msk [vmem:[#allocation0] sm:$0x1] %vm93_vm15, %v92_v30  }
  0x98   :  { %v99_v31 = vld [vmem:[#allocation0] sm:$0x1] }
  0x99   :  { %102 = vst [vmem:[%s210_s1] sm:$0x1] %v99_v31 }

// kernel: _lambda_.1
= control target key start
LH: loop header
LB: loop body
LE: loop exit
PB: predicated region body
PF: predicated region fallthrough
CT: control target
= control target key end

     0   :  { %s1456_s24 = smov 0   ;;  %s1710_s0 = inlined_call_operand.vmem [shape: f32[2,16,128], index: 0, kind: input, shape index: {}]   ;;  %s1711_s1 = inlined_call_operand.vmem [shape: bf16[3,128,128], index: 1, kind: input, shape index: {}]   ;;  %s1712_s2 = inlined_call_operand.vmem [shape: f32[1,128], index: 2, kind: input, shape index: {}, may-alias: {2,5}]   ;;  %s1713_s3 = inlined_call_operand.vmem [shape: f32[1,128], index: 3, kind: input, shape index: {}]   ;;  %s1714_s4 = inlined_call_operand.vmem [shape: bf16[3,128,128], index: 4, kind: input, shape index: {}]   ;;  %s1715_s5 = inlined_call_operand.vmem [shape: f32[1,128], index: 5, kind: input, shape index: {}, may-alias: {2,5}]   ;;  %s1716_s6 = inlined_call_operand.vmem [shape: f32[1,128], index: 6, kind: input, shape index: {}]   ;;  %s1717_s7 = inlined_call_operand.vmem [shape: f32[2,16,128], index: 7, kind: output, shape index: {}]  }
   0x1 LB: > { %s1045_s25 = sadd.s32 4294967295, %s1412_s24   ;;  %p1049_p0 = scmp.ge.s32.totalorder %s1412_s24, 1  ;;  %s1412_s24 = sphi %s1456_s24, %s17_s24  }
   0x2   : > { %p237_p1 = scmp.lt.s32.totalorder %s1412_s24, 3 }
   0x4   : > { %p238_p2 = pnand %p1049_p0, %p237_p1 }
   0x5   : > { %p269_p3 = scmp.lt.s32.totalorder (!%p238_p2), %s1045_s25, 1 }
   0x6   : > { %241 = sbr.rel (%p238_p2) target bundleno = 523 (0x20b), region = 48 }
   0xb   : > { %v1358_v0 = vld [vmem:[%s1711_s1 + $0x78] sm:$0xff]   ;;  %v1414_v1 = vmov 0.0   ;;  %v1360_v3 = vld [vmem:[%s1711_s1 + $0x70] sm:$0xff]   ;;  %vm1415_vm0 = vmmov 0   ;;  %v1362_v5 = vld [vmem:[%s1711_s1 + $0x68] sm:$0xff]   ;;  %s1719_s25 = smov (!%p269_p3, %s1045_s25), 1 }
   0xc   : > { %1228 = vmatprep.subr.bf16.mxu0 %v1414_v1  ;;  %280 = vst [vmem:[#allocation2] sm:$0x1] %v1414_v1  ;;  %281 = vst [vmem:[#allocation2 + $0x11] sm:$0x1] %v1414_v1  ;;  %1248 = vmatprep.subr.bf16.mxu1 %v1414_v1  ;;  %v1359_v2 = vld [vmem:[%s1711_s1 + $0x38] sm:$0xff]   ;;  %v1361_v4 = vld [vmem:[%s1711_s1 + $0x30] sm:$0xff]  }
   0xd   : > { %282 = vst [vmem:[#allocation3] sm:$0x1] %v1414_v1  ;;  %283 = vst [vmem:[#allocation3 + $0x11] sm:$0x1] %v1414_v1  ;;  %1229 = vmatpush3.bf16.msra.mxu0 %v1358_v0  ;;  %1244 = vmatprep.mubr.msk.bf16.mxu0 %vm1415_vm0, %v1414_v1  ;;  %v1363_v6 = vld [vmem:[%s1711_s1 + $0x28] sm:$0xff]   ;;  %v1364_v7 = vld [vmem:[%s1711_s1 + $0x60] sm:$0xff]  }
   0xe   : > { %1249 = vmatpush3.bf16.msra.mxu1 %v1359_v2  ;;  %1230 = vmatprep.subr.bf16.mxu0 %v1414_v1  ;;  %s1172_s17 = sshll.u32 %s1719_s25, 4  ;;  %v1365_v8 = vld [vmem:[%s1711_s1 + $0x20] sm:$0xff]   ;;  %v1366_v9 = vld [vmem:[%s1711_s1 + $0x58] sm:$0xff]   ;;  %v1368_v13 = vld [vmem:[%s1711_s1 + $0x50] sm:$0xff]  }
   0xf   : > { %1250 = vmatprep.subr.bf16.mxu1 %v1414_v1  ;;  %1264 = vmatprep.mubr.msk.bf16.mxu1 %vm1415_vm0, %v1414_v1  ;;  %s273_s22 = scalar_lea.vmem %s1710_s0, %s1172_s17  ;;  %v1367_v10 = vld [vmem:[%s1711_s1 + $0x18] sm:$0xff]   ;;  %v1369_v14 = vld [vmem:[%s1711_s1 + $0x10] sm:$0xff]   ;;  %v1370_v15 = vld [vmem:[%s1711_s1 + $0x48] sm:$0xff]   ;;  %s278_s12 = scalar_lea.vmem %s1717_s7, %s1172_s17 }
  0x10   : > { %v1520_v11 = vld [vmem:[%s273_s22] sm:$0xff]  ;;  %v1522_v12 = vld [vmem:[%s273_s22 + $0x8] sm:$0xff]  ;;  %v1374_v21 = vld [vmem:[%s1711_s1 + $0xb8] sm:$0xff]  }
  0x11   : > { %1231 = vmatpush3.bf16.msra.mxu0 %v1360_v3  ;;  %286 = vst [vmem:[#allocation2 + $0x1] sm:$0xff] %v1520_v11  ;;  %287 = vst [vmem:[#allocation2 + $0x9] sm:$0xff] %v1522_v12  ;;  %v1371_v16 = vld [vmem:[%s1711_s1 + $0x8] sm:$0xff]   ;;  %v1372_v17 = vld [vmem:[%s1711_s1 + $0x40] sm:$0xff]   ;;  %v309_v22 = vpack.c.bf16 %v1522_v12, %v1520_v11 }
  0x12   : > { %1251 = vmatpush3.bf16.msra.mxu1 %v1361_v4  ;;  %1232 = vmatprep.subr.bf16.mxu0 %v1414_v1  ;;  %v1373_v18 = vld [vmem:[%s1711_s1] sm:$0xff]   ;;  %v1375_v24 = vld [vmem:[%s1711_s1 + $0xb0] sm:$0xff]   ;;  %v1376_v25 = vld [vmem:[%s1711_s1 + $0xa8] sm:$0xff]  }
  0x13   : > { %1252 = vmatprep.subr.bf16.mxu1 %v1414_v1  ;;  %v1377_v26 = vld [vmem:[%s1711_s1 + $0xa0] sm:$0xff]   ;;  %v1378_v27 = vld [vmem:[%s1711_s1 + $0x98] sm:$0xff]   ;;  %v1379_v28 = vld [vmem:[%s1711_s1 + $0x90] sm:$0xff]  }
  0x14   : > { %v1380_v29 = vld [vmem:[%s1711_s1 + $0x88] sm:$0xff]   ;;  %v1381_v30 = vld [vmem:[%s1711_s1 + $0x80] sm:$0xff]   ;;  %v1382_v34 = vld [vmem:[%s1714_s4 + $0x78] sm:$0xff]  }
  0x15   : > { %1233 = vmatpush3.bf16.msra.mxu0 %v1362_v5  ;;  %v1383_v35 = vld [vmem:[%s1714_s4 + $0x38] sm:$0xff]   ;;  %v1384_v36 = vld [vmem:[%s1714_s4 + $0x70] sm:$0xff]   ;;  %v1386_v38 = vld [vmem:[%s1714_s4 + $0x68] sm:$0xff]  }
  0x16   : > { %1253 = vmatpush3.bf16.msra.mxu1 %v1363_v6  ;;  %1234 = vmatprep.subr.bf16.mxu0 %v1414_v1  ;;  %v1385_v37 = vld [vmem:[%s1714_s4 + $0x30] sm:$0xff]   ;;  %v1388_v39 = vld [vmem:[%s1714_s4 + $0x60] sm:$0xff]   ;;  %v1390_v40 = vld [vmem:[%s1714_s4 + $0x58] sm:$0xff]  }
  0x17   : > { %1254 = vmatprep.subr.bf16.mxu1 %v1414_v1  ;;  %v1387_v41 = vld [vmem:[%s1714_s4 + $0x28] sm:$0xff]   ;;  %v1392_v42 = vld [vmem:[%s1714_s4 + $0x50] sm:$0xff]   ;;  %v1389_v43 = vld [vmem:[%s1714_s4 + $0x20] sm:$0xff]  }
  0x18   : > { %v288_v19 = vld [vmem:[#allocation2] sm:$0xff]  ;;  %v289_v20 = vld [vmem:[#allocation2 + $0x8] sm:$0xff]  ;;  %v1391_v45 = vld [vmem:[%s1714_s4 + $0x18] sm:$0xff]  }
  0x19   : > { %1235 = vmatpush3.bf16.msra.mxu0 %v1364_v7  ;;  %v290_v23 = vpack.c.bf16 %v289_v20, %v288_v19  ;;  %v505_v31 = vld [vmem:[#allocation2 + $0x2] sm:$0xff]  ;;  %v506_v32 = vld [vmem:[#allocation2 + $0xa] sm:$0xff]  ;;  %v1110_v60 = vld [vmem:[%s1712_s2] ss:$0 sm:$0xff] }
  0x1a   : > { %1255 = vmatpush3.bf16.msra.mxu1 %v1365_v8  ;;  %1236 = vmatprep.subr.bf16.mxu0 %v1414_v1  ;;  %v507_v33 = vpack.c.bf16 %v506_v32, %v505_v31  ;;  %v1394_v44 = vld [vmem:[%s1714_s4 + $0x48] sm:$0xff]   ;;  %v1396_v46 = vld [vmem:[%s1714_s4 + $0x40] sm:$0xff]   ;;  %v1393_v47 = vld [vmem:[%s1714_s4 + $0x10] sm:$0xff]  }
  0x1b   : > { %1256 = vmatprep.subr.bf16.mxu1 %v1414_v1  ;;  %v1395_v48 = vld [vmem:[%s1714_s4 + $0x8] sm:$0xff]   ;;  %v1397_v49 = vld [vmem:[%s1714_s4] sm:$0xff]  }
  0x1c   : > { %v1111_v62 = vld [vmem:[%s1713_s3] ss:$0 sm:$0xff] }
  0x1d   : > { %1237 = vmatpush3.bf16.msra.mxu0 %v1366_v9  ;;  %v1401_v20 = vld [vmem:[%s1714_s4 + $0xa0] sm:$0xff]  }
  0x1e   : > { %1257 = vmatpush3.bf16.msra.mxu1 %v1367_v10  ;;  %1238 = vmatprep.subr.bf16.mxu0 %v1414_v1 }
  0x1f   : > { %1258 = vmatprep.subr.bf16.mxu1 %v1414_v1 }
  0x21   : > { %1239 = vmatpush3.bf16.msra.mxu0 %v1368_v13  ;;  %v1398_v13 = vld [vmem:[%s1714_s4 + $0xb8] sm:$0xff]  }
  0x22   : > { %1259 = vmatpush3.bf16.msra.mxu1 %v1369_v14  ;;  %1240 = vmatprep.subr.bf16.mxu0 %v1414_v1 }
  0x23   : > { %1260 = vmatprep.subr.bf16.mxu1 %v1414_v1 }
  0x25   : > { %1241 = vmatpush3.bf16.msra.mxu0 %v1370_v15  ;;  %v1399_v15 = vld [vmem:[%s1714_s4 + $0xb0] sm:$0xff]  }
  0x26   : > { %1261 = vmatpush3.bf16.msra.mxu1 %v1371_v16  ;;  %1242 = vmatprep.subr.bf16.mxu0 %v1414_v1 }
  0x27   : > { %1262 = vmatprep.subr.bf16.mxu1 %v1414_v1 }
  0x29   : > { %1243 = vmatpush3.bf16.msra.mxu0 %v1372_v17 }
  0x2a   : > { %1263 = vmatpush3.bf16.msra.mxu1 %v1373_v18  ;;  %1268 = vmatprep.subr.bf16.mxu0 %v1414_v1  ;;  %v1400_v18 = vld [vmem:[%s1714_s4 + $0xa8] sm:$0xff]  }
  0x2b   : > { %1288 = vmatprep.subr.bf16.mxu1 %v1414_v1 }
  0x2c   : > { %1245 = vmatmul.mubr.bf16.vlgmr.msra.gmra.mxu0 %v309_v22  ;;  %v1403_v22 = vld [vmem:[%s1714_s4 + $0x90] sm:$0xff]  }
  0x2d   : > { %1265 = vmatmul.mubr.bf16.vlgmr.msra.gmra.mxu1 %v290_v23  ;;  %1269 = vmatpush3.bf16.msra.mxu0 %v1374_v21  ;;  %v1402_v21 = vld [vmem:[%s1714_s4 + $0x98] sm:$0xff]   ;;  %v1404_v23 = vld [vmem:[%s1714_s4 + $0x88] sm:$0xff]  }
  0x2e   : > { %1270 = vmatprep.subr.bf16.mxu0 %v1414_v1  ;;  %1284 = vmatprep.mubr.msk.bf16.mxu0 %vm1415_vm0, %v1414_v1 }
  0x2f   : > { %1304 = vmatprep.mubr.msk.bf16.mxu1 %vm1415_vm0, %v1414_v1  ;;  %1289 = vmatpush3.bf16.msra.mxu1 %v1382_v34 }
  0x30   : > { %1290 = vmatprep.subr.bf16.mxu1 %v1414_v1 }
  0x31   : > { %1271 = vmatpush3.bf16.msra.mxu0 %v1375_v24  ;;  %v1405_v24 = vld [vmem:[%s1714_s4 + $0x80] sm:$0xff]  }
  0x32   : > { %1272 = vmatprep.subr.bf16.mxu0 %v1414_v1 }
  0x33   : > { %1291 = vmatpush3.bf16.msra.mxu1 %v1384_v36 }
  0x34   : > { %1292 = vmatprep.subr.bf16.mxu1 %v1414_v1 }
  0x35   : > { %1273 = vmatpush3.bf16.msra.mxu0 %v1376_v25 }
  0x36   : > { %1274 = vmatprep.subr.bf16.mxu0 %v1414_v1 }
  0x37   : > { %1293 = vmatpush3.bf16.msra.mxu1 %v1386_v38 }
  0x38   : > { %1294 = vmatprep.subr.bf16.mxu1 %v1414_v1 }
  0x39   : > { %1275 = vmatpush3.bf16.msra.mxu0 %v1377_v26 }
  0x3a   : > { %1276 = vmatprep.subr.bf16.mxu0 %v1414_v1 }
  0x3b   : > { %1295 = vmatpush3.bf16.msra.mxu1 %v1388_v39  ;;  %v1169_v39 = vld [vmem:[%s1716_s6] ss:$0 sm:$0xff] }
  0x3c   : > { %1296 = vmatprep.subr.bf16.mxu1 %v1414_v1 }
  0x3d   : > { %1277 = vmatpush3.bf16.msra.mxu0 %v1378_v27 }
  0x3e   : > { %1278 = vmatprep.subr.bf16.mxu0 %v1414_v1 }
  0x3f   : > { %1297 = vmatpush3.bf16.msra.mxu1 %v1390_v40 }
  0x40   : > { %1298 = vmatprep.subr.bf16.mxu1 %v1414_v1 }
  0x41   : > { %1279 = vmatpush3.bf16.msra.mxu0 %v1379_v28 }
  0x42   : > { %1280 = vmatprep.subr.bf16.mxu0 %v1414_v1 }
  0x43   : > { %1299 = vmatpush3.bf16.msra.mxu1 %v1392_v42 }
  0x44   : > { %1300 = vmatprep.subr.bf16.mxu1 %v1414_v1 }
  0x45   : > { %1281 = vmatpush3.bf16.msra.mxu0 %v1380_v29 }
  0x46   : > { %1282 = vmatprep.subr.bf16.mxu0 %v1414_v1 }
  0x47   : > { %1301 = vmatpush3.bf16.msra.mxu1 %v1394_v44 }
  0x48   : > { %1302 = vmatprep.subr.bf16.mxu1 %v1414_v1 }
  0x49   : > { %1283 = vmatpush3.bf16.msra.mxu0 %v1381_v30 }
  0x4a   : > { %1308 = vmatprep.subr.bf16.mxu0 %v1414_v1 }
  0x4b   : > { %1303 = vmatpush3.bf16.msra.mxu1 %v1396_v46 }
  0x4c   : > { %1285 = vmatmul.mubr.bf16.vlgmr.msra.gmra.mxu0 %v507_v33  ;;  %1328 = vmatprep.subr.bf16.mxu1 %v1414_v1 }
  0x4d   : > { %1324 = vmatprep.mubr.msk.bf16.mxu0 %vm1415_vm0, %v1414_v1  ;;  %1309 = vmatpush3.bf16.msra.mxu0 %v1383_v35 }
  0x4e   : > { %1310 = vmatprep.subr.bf16.mxu0 %v1414_v1 }
  0x51   : > { %1311 = vmatpush3.bf16.msra.mxu0 %v1385_v37 }
  0x52   : > { %1312 = vmatprep.subr.bf16.mxu0 %v1414_v1 }
  0x55   : > { %1313 = vmatpush3.bf16.msra.mxu0 %v1387_v41 }
  0x56   : > { %1314 = vmatprep.subr.bf16.mxu0 %v1414_v1 }
  0x59   : > { %1315 = vmatpush3.bf16.msra.mxu0 %v1389_v43 }
  0x5a   : > { %1316 = vmatprep.subr.bf16.mxu0 %v1414_v1 }
  0x5d   : > { %1317 = vmatpush3.bf16.msra.mxu0 %v1391_v45 }
  0x5e   : > { %1318 = vmatprep.subr.bf16.mxu0 %v1414_v1 }
  0x61   : > { %1319 = vmatpush3.bf16.msra.mxu0 %v1393_v47 }
  0x62   : > { %1320 = vmatprep.subr.bf16.mxu0 %v1414_v1 }
  0x65   : > { %1321 = vmatpush3.bf16.msra.mxu0 %v1395_v48 }
  0x66   : > { %1322 = vmatprep.subr.bf16.mxu0 %v1414_v1 }
  0x69   : > { %1323 = vmatpush3.bf16.msra.mxu0 %v1397_v49 }
  0xec   : > { %v409_v50 = vpop.f32.mrf.mxu0 }
  0xed   : > { %v498_v51 = vpop.f32.mrf.mxu1 }
  0xee   : > { %v1246_v52 = vpop.f32.mrf.mxu0  ;;  %v499_v58 = vadd.f32 %v498_v51, %v409_v50 }
  0xef   : > { %v1266_v53 = vpop.f32.mrf.mxu1 }
  0xf0   : > { %v412_v54 = vpop.f32.mrf.mxu0 }
  0xf1   : > { %v501_v55 = vpop.f32.mrf.mxu1 }
  0xf2   : > { %v1247_v56 = vpop.f32.mrf.mxu0  ;;  %v502_v0 = vadd.f32 %v501_v55, %v412_v54 }
  0xf3   : > { %v1267_v57 = vpop.f32.mrf.mxu1 }
 0x10c   : > { %v607_v59 = vpop.f32.mrf.mxu0 }
 0x10d   : > { %v614_v61 = vadd.f32 %v607_v59, %v499_v58 }
 0x10e   : > { %v1286_v63 = vpop.f32.mrf.mxu0 }
 0x10f   : > { %v623_v2 = vmul.f32 %v1110_v60, %v614_v61 }
 0x110   : > { %v610_v3 = vpop.f32.mrf.mxu0 }
 0x111   : > { %v632_v4 = vadd.f32 %v1111_v62, %v623_v2  ;;  %v615_v5 = vadd.f32 %v610_v3, %v502_v0 }
 0x112   : > { %v1287_v6 = vpop.f32.mrf.mxu0 }
 0x113   : > { %v634_v7 = vmax.f32 %v632_v4, 0.0  ;;  %v624_v8 = vmul.f32 %v1110_v60, %v615_v5 }
 0x115   : > { %636 = vst [vmem:[#allocation3 + $0x1] sm:$0xff] %v634_v7  ;;  %v633_v9 = vadd.f32 %v1111_v62, %v624_v8 }
 0x117   : > { %v635_v10 = vmax.f32 %v633_v9, 0.0 }
 0x119   : > { %637 = vst [vmem:[#allocation3 + $0x9] sm:$0xff] %v635_v10  ;;  %v659_v14 = vpack.c.bf16 %v635_v10, %v634_v7 }
 0x11b   : > { %1305 = vmatmul.mubr.bf16.vlgmr.msra.gmra.mxu1 %v659_v14 }
 0x11c   : > { %1329 = vmatpush3.bf16.msra.mxu1 %v1398_v13  ;;  %1344 = vmatprep.mubr.msk.bf16.mxu1 %vm1415_vm0, %v1414_v1  ;;  %v638_v16 = vld [vmem:[#allocation3] sm:$0xff] }
 0x11d   : > { %1330 = vmatprep.subr.bf16.mxu1 %v1414_v1 }
 0x120   : > { %v639_v17 = vld [vmem:[#allocation3 + $0x8] sm:$0xff]  ;;  %1331 = vmatpush3.bf16.msra.mxu1 %v1399_v15 }
 0x121   : > { %v640_v19 = vpack.c.bf16 %v639_v17, %v638_v16  ;;  %1332 = vmatprep.subr.bf16.mxu1 %v1414_v1  ;;  %v855_v25 = vld [vmem:[#allocation3 + $0x2] sm:$0xff]  ;;  %v856_v26 = vld [vmem:[#allocation3 + $0xa] sm:$0xff] }
 0x122   : > { %v857_v27 = vpack.c.bf16 %v856_v26, %v855_v25 }
 0x123   : > { %1325 = vmatmul.mubr.bf16.vlgmr.msra.gmra.mxu0 %v640_v19 }
 0x124   : > { %1333 = vmatpush3.bf16.msra.mxu1 %v1400_v18 }
 0x125   : > { %1334 = vmatprep.subr.bf16.mxu1 %v1414_v1 }
 0x128   : > { %1335 = vmatpush3.bf16.msra.mxu1 %v1401_v20 }
 0x129   : > { %1336 = vmatprep.subr.bf16.mxu1 %v1414_v1 }
 0x12c   : > { %1337 = vmatpush3.bf16.msra.mxu1 %v1402_v21 }
 0x12d   : > { %1338 = vmatprep.subr.bf16.mxu1 %v1414_v1 }
 0x130   : > { %1339 = vmatpush3.bf16.msra.mxu1 %v1403_v22 }
 0x131   : > { %1340 = vmatprep.subr.bf16.mxu1 %v1414_v1 }
 0x134   : > { %1341 = vmatpush3.bf16.msra.mxu1 %v1404_v23 }
 0x135   : > { %1342 = vmatprep.subr.bf16.mxu1 %v1414_v1  ;;  %v1168_v1 = vld [vmem:[%s1715_s5] ss:$0 sm:$0xff] }
 0x138   : > { %1343 = vmatpush3.bf16.msra.mxu1 %v1405_v24 }
 0x13b   : > { %1345 = vmatmul.mubr.bf16.vlgmr.msra.gmra.mxu1 %v857_v27 }
 0x1db   : > { %v759_v28 = vpop.f32.mrf.mxu1 }
 0x1dd   : > { %v1306_v29 = vpop.f32.mrf.mxu1 }
 0x1df   : > { %v762_v30 = vpop.f32.mrf.mxu1 }
 0x1e1   : > { %v1307_v31 = vpop.f32.mrf.mxu1 }
 0x1e3   : > { %v848_v32 = vpop.f32.mrf.mxu0 }
 0x1e4   : > { %v849_v36 = vadd.f32 %v848_v32, %v759_v28 }
 0x1e5   : > { %v1326_v33 = vpop.f32.mrf.mxu0 }
 0x1e7   : > { %v851_v34 = vpop.f32.mrf.mxu0 }
 0x1e8   : > { %v852_v41 = vadd.f32 %v851_v34, %v762_v30 }
 0x1e9   : > { %v1327_v35 = vpop.f32.mrf.mxu0 }
 0x1fb   : > { %v957_v37 = vpop.f32.mrf.mxu1 }
 0x1fc   : > { %v964_v38 = vadd.f32 %v957_v37, %v849_v36 }
 0x1fd   : > { %v1346_v40 = vpop.f32.mrf.mxu1 }
 0x1fe   : > { %v973_v42 = vmul.f32 %v1168_v1, %v964_v38 }
 0x1ff   : > { %v960_v43 = vpop.f32.mrf.mxu1 }
 0x200   : > { %v982_v44 = vadd.f32 %v1169_v39, %v973_v42  ;;  %v965_v45 = vadd.f32 %v960_v43, %v852_v41 }
 0x201   : > { %v1347_v46 = vpop.f32.mrf.mxu1 }
 0x202   : > { %v984_v47 = vmax.f32 %v982_v44, 0.0  ;;  %v974_v48 = vmul.f32 %v1168_v1, %v965_v45 }
 0x204   : > { %v986_v49 = vadd.f32 %v984_v47, %v1520_v11  ;;  %v983_v50 = vadd.f32 %v1169_v39, %v974_v48 }
 0x206   : > { %988 = vst [vmem:[%s278_s12] sm:$0xff] %v986_v49  ;;  %v985_v51 = vmax.f32 %v983_v50, 0.0 }
 0x208   : > { %v987_v52 = vadd.f32 %v985_v51, %v1522_v12 }
 0x20a   : > { %989 = vst [vmem:[%s278_s12 + $0x8] sm:$0xff] %v987_v52 }
 0x20b PF: > { %s17_s24 = sadd.s32 1, %s1412_s24  }
 0x20c   : > { %p14_p4 = scmp.ge.s32.totalorder %s17_s24, 4  }
 0x20e   :  { %16 = sbr.rel (!%p14_p4) target bundleno = 1 (0x1), region = 82 }

</bundles_post_ra>
